<compile_context>
chip_gen: v7x
topology: tpu7x:2x2x1
jax: 0.10.0
libtpu: 0.0.40
codegen_flags: <defaults>
</compile_context>

<pallas_src>
import functools
import math

import jax
import jax.numpy as jnp
from jax.experimental import pallas as pl
from jax.experimental.pallas import tpu as pltpu


def diffusion_trainer_kernel(
    x0_ref,     # VMEM f32 [RBLK, HW]  clean images; rows ordered (sample, channel)
    noise_ref,  # VMEM f32 [RBLK, HW]  gaussian noise
    coef_ref,   # VMEM f32 [RBLK, 8]   lane0=sqrt(ab[t]), lane1=sqrt(1-ab[t]), lane2=add
    wd_ref,     # VMEM f32 [G, G]      block-diagonal 1x1-conv weight (resident)
    loss_ref,   # VMEM f32 [RBLK, HW]  output: element-wise MSE
    *, g, n_groups,
):
    wd = wd_ref[...]

    def group_body(j):
        r0 = j * g
        if g % 8 == 0 and not isinstance(r0, int):
            r0 = pl.multiple_of(r0, 8)
        rows = pl.ds(r0, g)

        a = coef_ref[rows, 0:1]        # sqrt(alphas_bar)[t]        per row
        s = coef_ref[rows, 1:2]        # sqrt(1 - alphas_bar)[t]    per row
        add = coef_ref[rows, 2:3]      # bias + gain * temb[t]      per row

        x0 = x0_ref[rows, :]
        nz = noise_ref[rows, :]

        # forward diffusion on this aligned group only (no full-block temp)
        x_t = a * x0 + s * nz

        # synthetic model(x_t, t): block-diagonal channel mix + additive term
        pred = jnp.dot(wd, x_t, preferred_element_type=jnp.float32) + add

        # F.mse_loss(pred, noise, reduction='none'), whole-tile store
        d = pred - nz
        loss_ref[rows, :] = d * d

    if n_groups <= 16:
        for j in range(n_groups):      # short static unroll
            group_body(j)
    else:
        pl.loop(0, n_groups)(group_body)


def _choose_bblk(B, C, HW, max_block_bytes, min_grid_steps=8):
    """Samples per grid step: divisor of B, row-block aligned, byte-capped."""
    bytes_per_sample = C * HW * 4
    divisors = [d for d in range(1, B + 1) if B % d == 0]
    fitting = [d for d in divisors if d * bytes_per_sample <= max_block_bytes]
    if not fitting:
        fitting = [1]
    # (8,128): row-block must be a multiple of 8 sublanes or cover the array
    aligned = [d for d in fitting if (d * C) % 8 == 0 or d == B]
    pool = aligned if aligned else fitting
    # prefer enough grid steps for megacore split / pipeline overlap (v7x)
    stepped = [d for d in pool if B // d >= min_grid_steps]
    if stepped:
        pool = stepped
    bblk = max(pool)
    if (bblk * C) % 8 != 0 and bblk != B:
        bblk = B   # fall back to a single full-array block (always legal)
    return bblk


def _choose_group(rblk, C, cap=128):
    """Group size: multiple of lcm(8, C) dividing rblk, <= cap (MXU-friendly)."""
    base = (8 * C) // math.gcd(8, C)
    if rblk % base != 0:
        return rblk                      # single group covering the block
    g = base
    for cand in range(base, min(rblk, cap) + 1, base):
        if rblk % cand == 0:
            g = cand
    return g


def gaussian_diffusion_trainer_fwd(x_0, t, noise, sab, somab, temb, w, bias, gain,
                                   *, max_block_bytes=4 * 1024 * 1024):
    """Trainer forward; returns the element-wise loss with the shape of x_0."""
    B, C, H, W = x_0.shape
    HW = H * W
    R = B * C

    x0f = x_0.reshape(R, HW).astype(jnp.float32)
    noisef = noise.reshape(R, HW).astype(jnp.float32)

    # extract(): gather the schedule at the sampled timesteps once, in the
    # wrapper, on tiny [B] arrays, fold the additive term, and pack all
    # per-row coefficients into one (R, 8) operand (lanes 0/1/2 used).
    a_col = jnp.repeat(sab[t].astype(jnp.float32), C)           # [R]
    s_col = jnp.repeat(somab[t].astype(jnp.float32), C)         # [R]
    te_col = jnp.repeat(temb[t].astype(jnp.float32), C)         # [R]
    bias_row = jnp.tile(bias.reshape(-1).astype(jnp.float32), B)
    gain_row = jnp.tile(gain.reshape(-1).astype(jnp.float32), B)
    add_col = bias_row + gain_row * te_col                      # [R]
    coef = jnp.zeros((R, 8), jnp.float32)
    coef = coef.at[:, 0].set(a_col).at[:, 1].set(s_col).at[:, 2].set(add_col)

    # block sizing
    bblk = _choose_bblk(B, C, HW, max_block_bytes)
    rblk = bblk * C
    grid = (R // rblk,)

    # aligned group size + block-diagonal weight Wd = I_{G/C} (x) W
    G = _choose_group(rblk, C)
    n_groups = rblk // G
    reps = G // C
    wd = jnp.kron(jnp.eye(reps, dtype=jnp.float32), w.astype(jnp.float32))

    # VMEM budget: double-buffered x0 + noise + loss blocks, plus the packed
    # coefficient block (lane-padded to 128), Wd and the per-group temps.
    block_bytes = rblk * HW * 4
    vmem_limit = int(min(max(2 * 3 * block_bytes + (8 << 20), 32 << 20), 48 << 20))

    grid_spec = pltpu.PrefetchScalarGridSpec(
        num_scalar_prefetch=0,
        grid=grid,
        in_specs=[
            pl.BlockSpec((rblk, HW), lambda i: (i, 0)),   # x_0 rows
            pl.BlockSpec((rblk, HW), lambda i: (i, 0)),   # noise rows
            pl.BlockSpec((rblk, 8), lambda i: (i, 0)),    # packed coefficients
            pl.BlockSpec((G, G), lambda i: (0, 0)),       # Wd, resident
        ],
        out_specs=pl.BlockSpec((rblk, HW), lambda i: (i, 0)),
    )

    loss_flat = pl.pallas_call(
        functools.partial(diffusion_trainer_kernel, g=G, n_groups=n_groups),
        out_shape=jax.ShapeDtypeStruct((R, HW), jnp.float32),
        grid_spec=grid_spec,
        compiler_params=pltpu.CompilerParams(
            dimension_semantics=("parallel",),
            vmem_limit_bytes=vmem_limit),
    )(x0f, noisef, coef, wd)

    return loss_flat.reshape(B, C, H, W)


def reference_fwd(x_0, t, noise, sab, somab, temb, w, bias, gain):
    """Pure-JAX reference mirroring the PyTorch semantics."""
    B = x_0.shape[0]
    a = sab[t].reshape(B, 1, 1, 1)
    s = somab[t].reshape(B, 1, 1, 1)
    x_t = a * x_0 + s * noise
    pred = jnp.einsum('oc,bchw->bohw', w, x_t)
    pred = pred + bias.reshape(1, -1, 1, 1)
    pred = pred + gain.reshape(1, -1, 1, 1) * temb[t].reshape(B, 1, 1, 1)
    return (pred - noise) ** 2


if __name__ == "__main__":
    # small shapes consistent with the module
    B, C, H, W = 2, 4, 16, 16
    T = 1000
    beta_1, beta_T = 1e-4, 0.02

    # diffusion schedule (same math as the register_buffer setup, in float32)
    betas = jnp.linspace(beta_1, beta_T, T, dtype=jnp.float32)
    alphas = 1.0 - betas
    alphas_bar = jnp.cumprod(alphas, axis=0)
    sqrt_alphas_bar = jnp.sqrt(alphas_bar)
    sqrt_one_minus_alphas_bar = jnp.sqrt(1.0 - alphas_bar)

    # deterministic synthetic-model parameters
    key = jax.random.PRNGKey(0)
    k_x, k_noise, k_t, k_w, k_b, k_g = jax.random.split(key, 6)
    w = (jax.random.normal(k_w, (C, C), dtype=jnp.float32) * 0.1
         + jnp.eye(C, dtype=jnp.float32))
    bias = jax.random.normal(k_b, (C,), dtype=jnp.float32) * 0.05
    gain = 1.0 + jax.random.normal(k_g, (C,), dtype=jnp.float32) * 0.1
    temb = jnp.sin(jnp.arange(T, dtype=jnp.float32) / T * 2.0 * jnp.pi)

    # forward-pass random draws (torch.randint / torch.randn_like equivalents)
    x_0 = jax.random.normal(k_x, (B, C, H, W), dtype=jnp.float32)
    noise = jax.random.normal(k_noise, (B, C, H, W), dtype=jnp.float32)
    t = jax.random.randint(k_t, (B,), 0, T, dtype=jnp.int32)

    loss = gaussian_diffusion_trainer_fwd(
        x_0, t, noise, sqrt_alphas_bar, sqrt_one_minus_alphas_bar,
        temb, w, bias, gain)
    loss = jax.block_until_ready(loss)

    ref = reference_fwd(
        x_0, t, noise, sqrt_alphas_bar, sqrt_one_minus_alphas_bar,
        temb, w, bias, gain)

    assert loss.shape == x_0.shape, loss.shape
    assert jnp.allclose(loss, ref, rtol=1e-4, atol=1e-4), "mismatch vs reference"
    print("KERNEL_OK")
</pallas_src>

<mosaic_0001>
module attributes {stable_mosaic.version = 11 : i64} {
  func.func @diffusion_trainer_kernel(%arg0: i32, %arg1: memref<8x256xf32, #tpu.memory_space<vmem>>, %arg2: memref<8x256xf32, #tpu.memory_space<vmem>>, %arg3: memref<8x8xf32, #tpu.memory_space<vmem>>, %arg4: memref<8x8xf32, #tpu.memory_space<vmem>>, %arg5: memref<8x256xf32, #tpu.memory_space<vmem>>) attributes {dimension_semantics = [#tpu.dimension_semantics<parallel>], iteration_bounds = array<i64: 1>, scalar_prefetch = 0 : i64, scratch_operands = 0 : i64, tpu.core_type = #tpu.core_type<tc>, window_params = [{transform_indices = @transform_0, window_bounds = array<i64: 8, 256>}, {transform_indices = @transform_1, window_bounds = array<i64: 8, 256>}, {transform_indices = @transform_2, window_bounds = array<i64: 8, 8>}, {pipeline_mode = #tpu.pipeline_mode<synchronous>, transform_indices = @transform_3, window_bounds = array<i64: 8, 8>}, {transform_indices = @transform_4, window_bounds = array<i64: 8, 256>}]} {
    %c0 = arith.constant 0 : index
    %c0_0 = arith.constant 0 : index
    %0 = vector.load %arg4[%c0, %c0_0] : memref<8x8xf32, #tpu.memory_space<vmem>>, vector<8x8xf32>
    %c0_1 = arith.constant 0 : index
    %c0_2 = arith.constant 0 : index
    %1 = vector.load %arg3[%c0_1, %c0_2] : memref<8x8xf32, #tpu.memory_space<vmem>>, vector<8x1xf32>
    %c0_3 = arith.constant 0 : index
    %c1 = arith.constant 1 : index
    %2 = vector.load %arg3[%c0_3, %c1] : memref<8x8xf32, #tpu.memory_space<vmem>>, vector<8x1xf32>
    %c0_4 = arith.constant 0 : index
    %c2 = arith.constant 2 : index
    %3 = vector.load %arg3[%c0_4, %c2] : memref<8x8xf32, #tpu.memory_space<vmem>>, vector<8x1xf32>
    %c0_5 = arith.constant 0 : index
    %c0_6 = arith.constant 0 : index
    %4 = vector.load %arg1[%c0_5, %c0_6] : memref<8x256xf32, #tpu.memory_space<vmem>>, vector<8x256xf32>
    %c0_7 = arith.constant 0 : index
    %c0_8 = arith.constant 0 : index
    %5 = vector.load %arg2[%c0_7, %c0_8] : memref<8x256xf32, #tpu.memory_space<vmem>>, vector<8x256xf32>
    %6 = vector.broadcast %1 : vector<8x1xf32> to vector<8x256xf32>
    %7 = arith.mulf %6, %4 : vector<8x256xf32>
    %8 = vector.broadcast %2 : vector<8x1xf32> to vector<8x256xf32>
    %9 = arith.mulf %8, %5 : vector<8x256xf32>
    %10 = arith.addf %7, %9 : vector<8x256xf32>
    %cst = arith.constant dense<0.000000e+00> : vector<8x256xf32>
    %11 = tpu.matmul %0, %10, %cst {dimension_numbers = #tpu.dot_dimension_numbers<[1], [0], [0], [1], [0, 0, 1, 1], [], []>} : vector<8x8xf32>, vector<8x256xf32>, vector<8x256xf32> -> vector<8x256xf32>
    %12 = vector.broadcast %3 : vector<8x1xf32> to vector<8x256xf32>
    %13 = arith.addf %11, %12 : vector<8x256xf32>
    %14 = arith.subf %13, %5 : vector<8x256xf32>
    %15 = arith.mulf %14, %14 : vector<8x256xf32>
    %c0_9 = arith.constant 0 : index
    %c0_10 = arith.constant 0 : index
    %16 = vector.load %arg5[%c0_9, %c0_10] : memref<8x256xf32, #tpu.memory_space<vmem>>, vector<8x256xf32>
    tpu.vector_store %arg5[%c0_9, %c0_10], %15 {strides = array<i32>} : memref<8x256xf32, #tpu.memory_space<vmem>>, vector<8x256xf32>,
    return
  }
  func.func @transform_0(%arg0: i32) -> (i32, i32) {
    %c0_i32 = arith.constant 0 : i32
    %c0_i32_0 = arith.constant 0 : i32
    return %arg0, %c0_i32 : i32, i32
  }
  func.func @transform_1(%arg0: i32) -> (i32, i32) {
    %c0_i32 = arith.constant 0 : i32
    %c0_i32_0 = arith.constant 0 : i32
    return %arg0, %c0_i32 : i32, i32
  }
  func.func @transform_2(%arg0: i32) -> (i32, i32) {
    %c0_i32 = arith.constant 0 : i32
    %c0_i32_0 = arith.constant 0 : i32
    return %arg0, %c0_i32 : i32, i32
  }
  func.func @transform_3(%arg0: i32) -> (i32, i32) {
    %c0_i32 = arith.constant 0 : i32
    %c0_i32_0 = arith.constant 0 : i32
    %c0_i32_1 = arith.constant 0 : i32
    return %c0_i32, %c0_i32_0 : i32, i32
  }
  func.func @transform_4(%arg0: i32) -> (i32, i32) {
    %c0_i32 = arith.constant 0 : i32
    %c0_i32_0 = arith.constant 0 : i32
    return %arg0, %c0_i32 : i32, i32
  }
}

</mosaic_0001>

<bundles_post_ra>
// kernel: tpu_custom_call.1
= control target key start
LH: loop header
LB: loop body
LE: loop exit
PB: predicated region body
PF: predicated region fallthrough
CT: control target
= control target key end

     0   :  { %9 = vsyncpa [#allocation3], 0  ;;  %s366_s0 = inlined_call_operand.hbm [shape: f32[8,256], index: 0, kind: input, shape index: {}]   ;;  %s367_s1 = inlined_call_operand.hbm [shape: f32[8,256], index: 1, kind: input, shape index: {}]   ;;  %s368_s2 = inlined_call_operand.hbm [shape: f32[8,8], index: 2, kind: input, shape index: {}]   ;;  %s369_s3 = inlined_call_operand.vmem [shape: f32[8,8], index: 3, kind: input, shape index: {}]   ;;  %s370_s4 = inlined_call_operand.hbm [shape: f32[8,256], index: 4, kind: output, shape index: {}]  }
   0x1   :  { %10 = vsyncpa [#allocation6], 0 }
   0x2   :  { %11 = vsyncpa [#allocation4], 0  ;;  %s282_s15 = smov [#allocation5]   ;;  %s283_s17 = smov [#allocation2]  }
   0x3   :  { %s28_s16 = sshll.u32 %s282_s15, 4  ;;  %s18_s18 = sshll.u32 %s283_s17, 4  ;;  %s29_s16 = int_to_ptr.vmem [resolvable:$true] %s28_s16  ;;  %s19_s18 = int_to_ptr.vmem [resolvable:$true] %s18_s18 }
   0x4   :  { %s188_s21 = scalar_lea.hbm %s367_s1, 256 }
   0x5   :  { %p189_p0 = scmp.ne.s32.totalorder %s367_s1, %s188_s21  ;;  %p192_p1 = scmp.lt.u32.totalorder %s188_s21, %s367_s1 }
   0x7   :  { %p194_p2 = pnand %p192_p1, %p189_p0 }
   0x9   :  { %197 = shalt.err (!%p194_p2)
}
   0xa   :  { %s198_s26 = scalar_lea.vmem %s29_s16, 256  ;;  %p203_p4 = scmp.lt.s32.totalorder %s29_s16, %s29_s16 }
   0xb   :  { %p199_p3 = scmp.ne.s32.totalorder %s29_s16, %s198_s26  ;;  %p204_p5 = scmp.lt.s32.totalorder %s198_s26, %s198_s26 }
   0xd   :  { %p205_p6 = por %p204_p5, %p203_p4 }
   0xf   :  { %p206_p7 = pnand %p205_p6, %p199_p3 }
  0x11   :  { %209 = shalt.err (!%p206_p7)
}
  0x12   :  { %31 = dma.hbm_to_vmem [thread:$0]  %s367_s1, 256, %s29_s16, [#allocation6]  }
  0x13   :  { %s210_s5 = scalar_lea.hbm %s366_s0, 256 }
  0x14   :  { %p211_p8 = scmp.ne.s32.totalorder %s366_s0, %s210_s5  ;;  %p214_p9 = scmp.lt.u32.totalorder %s210_s5, %s366_s0 }
  0x16   :  { %p216_p10 = pnand %p214_p9, %p211_p8 }
  0x18   :  { %219 = shalt.err (!%p216_p10)
}
  0x19   :  { %s220_s10 = scalar_lea.vmem %s19_s18, 256  ;;  %p225_p12 = scmp.lt.s32.totalorder %s19_s18, %s19_s18 }
  0x1a   :  { %p221_p11 = scmp.ne.s32.totalorder %s19_s18, %s220_s10  ;;  %p226_p13 = scmp.lt.s32.totalorder %s220_s10, %s220_s10 }
  0x1c   :  { %p227_p0 = por %p226_p13, %p225_p12 }
  0x1e   :  { %p228_p1 = pnand %p227_p0, %p221_p11 }
  0x20   :  { %231 = shalt.err (!%p228_p1)
}
  0x21   :  { %21 = dma.hbm_to_vmem [thread:$0]  %s366_s0, 256, %s19_s18, [#allocation3]  }
  0x22   :  { %s284_s12 = smov [#allocation7]   ;;  %s232_s16 = scalar_lea.hbm %s368_s2, 128 }
  0x23   :  { %s38_s13 = sshll.u32 %s284_s12, 4  ;;  %p233_p2 = scmp.ne.s32.totalorder %s368_s2, %s232_s16  ;;  %s39_s13 = int_to_ptr.vmem [resolvable:$true] %s38_s13 }
  0x24   :  { %p236_p3 = scmp.lt.u32.totalorder %s232_s16, %s368_s2 }
  0x26   :  { %p238_p4 = pnand %p236_p3, %p233_p2 }
  0x28   :  { %241 = shalt.err (!%p238_p4)
}
  0x29   :  { %s242_s22 = scalar_lea.vmem %s39_s13, 128  ;;  %p247_p6 = scmp.lt.s32.totalorder %s39_s13, %s39_s13 }
  0x2a   :  { %p243_p5 = scmp.ne.s32.totalorder %s39_s13, %s242_s22  ;;  %p248_p7 = scmp.lt.s32.totalorder %s242_s22, %s242_s22 }
  0x2c   :  { %p249_p8 = por %p248_p7, %p247_p6 }
  0x2e   :  { %p250_p9 = pnand %p249_p8, %p243_p5 }
  0x30   :  { %253 = shalt.err (!%p250_p9)
}
  0x31   :  { %41 = dma.hbm_to_vmem [thread:$0]  %s368_s2, 128, %s39_s13, [#allocation6]  }
  0x32   :  { %276 = dma.done.wait [#allocation3], 256  }
  0x33   :  { %277 = vsyncadd [#allocation3], 4294967040 }
  0x34   :  { %278 = dma.done.wait [#allocation6], 384  }
  0x35   :  { %279 = vsyncadd [#allocation6], 4294966912  ;;  %v285_v0 = vmov 0   ;;  %v54_v1 = vld [vmem:[#allocation7] sm:$0xff]  ;;  %v286_v2 = vmov 1   ;;  %v287_v3 = vmov 0.0  }
  0x36   :  { %184 = vset.pattern.permute.xlu0 %v285_v0  ;;  %146 = vmatprep.mubr.f32.mxu0 %v287_v3  ;;  %v288_v4 = vmov 2   ;;  %v55_v6 = vld [vmem:[#allocation2] sm:$0xff]  ;;  %v56_v7 = vld [vmem:[#allocation2 + $0x8] sm:$0xff]  ;;  %v57_v8 = vld [vmem:[#allocation5] sm:$0xff]  ;;  %vm78_vm0 = vcmask 64512   ;;  %s289_s24 = smov [#allocation8]  }
  0x37   :  { %61 = vperm.xlu0 %184, %v54_v1   ;;  %186 = vset.pattern.permute.xlu1 %v288_v4  ;;  %v58_v9 = vld [vmem:[#allocation5 + $0x8] sm:$0xff]  ;;  %v53_v17 = vld [vmem:[%s369_s3] sm:$0xff]  ;;  %s165_s25 = sshll.u32 %s289_s24, 4  ;;  %s166_s25 = int_to_ptr.vmem [resolvable:$true] %s165_s25 }
  0x38   :  { %75 = vperm.xlu1 %186, %v54_v1   ;;  %s254_s26 = scalar_lea.vmem %s166_s25, 256  ;;  %p259_p11 = scmp.lt.s32.totalorder %s166_s25, %s166_s25 }
  0x39   :  { %p255_p10 = scmp.ne.s32.totalorder %s166_s25, %s254_s26  ;;  %p260_p12 = scmp.lt.s32.totalorder %s254_s26, %s254_s26 }
  0x3b   :  { %185 = vset.pattern.permute.xlu0 %v286_v2  ;;  %p261_p13 = por %p260_p12, %p259_p11 }
  0x3c   :  { %67 = vperm.xlu0 %185, %v54_v1  }
  0x3d   :  { %p262_p0 = pnand %p261_p13, %p255_p10 }
  0x40   :  { %187 = vset.pattern.permute.xlu0 %v288_v4 }
  0xb6   :  { %v62_v5 = vpop.permute.xlu0 %61 }
  0xb7   :  { %v64_v11 = vmul.f32 %v62_v5, %v55_v6  ;;  %v65_v12 = vmul.f32 %v62_v5, %v56_v7  ;;  %v76_v18 = vpop.permute.xlu1 %75 }
  0xbb   :  { %v68_v10 = vpop.permute.xlu0 %67 }
  0xbc   :  { %v70_v13 = vmul.f32 %v68_v10, %v57_v8  ;;  %v71_v14 = vmul.f32 %v68_v10, %v58_v9 }
  0xbe   :  { %v73_v15 = vadd.f32 %v71_v14, %v65_v12  ;;  %v72_v16 = vadd.f32 %v70_v13, %v64_v11 }
  0xc0   :  { %82 = vmatprep.subr.mxu0 %v73_v15 }
  0xc1   :  { %83 = vmatpush1.msra.mxu0 %v72_v16 }
  0xc2   :  { %175 = vmatmul.mubr.msk.f32.vlgmr.msra.gmra.mrb[0].mxu0 %vm78_vm0, %v53_v17 }
 0x195   :  { %v148_v19 = vpop.f32.mrb[0].mxu0 }
 0x196   :  { %v149_v20 = vadd.f32 %v148_v19, %v76_v18  ;;  %v150_v21 = vpop.f32.mrb[1].mxu0 }
 0x197   :  { %v151_v22 = vadd.f32 %v150_v21, %v76_v18 }
 0x198   :  { %v153_v23 = vsub.f32 %v149_v20, %v57_v8 }
 0x199   :  { %v154_v24 = vsub.f32 %v151_v22, %v58_v9 }
 0x19a   :  { %v155_v25 = vmul.f32 %v153_v23, %v153_v23 }
 0x19b   :  { %v156_v26 = vmul.f32 %v154_v24, %v154_v24 }
 0x19c   :  { %157 = vst [vmem:[#allocation8] sm:$0xff] %v155_v25 }
 0x19d   :  { %158 = vst [vmem:[#allocation8 + $0x8] sm:$0xff] %v156_v26 }
 0x19e   :  { %265 = shalt.err (!%p262_p0)
}
 0x19f   :  { %s266_s28 = scalar_lea.hbm %s370_s4, 256 }
 0x1a0   :  { %p267_p1 = scmp.ne.s32.totalorder %s370_s4, %s266_s28  ;;  %p270_p2 = scmp.lt.u32.totalorder %s266_s28, %s370_s4 }
 0x1a2   :  { %p272_p3 = pnand %p270_p2, %p267_p1 }
 0x1a4   :  { %275 = shalt.err (!%p272_p3)
}
 0x1a5   :  { %168 = dma.vmem_to_hbm [thread:$0]  %s166_s25, 256, %s370_s4, [#allocation4]  }
 0x1a6   :  { %280 = dma.done.wait [#allocation4], 256  }
 0x1a7   :  { %281 = vsyncadd [#allocation4], 4294967040 }
 0x1a8   :  { %172 = vsyncpa [#allocation3], 1 }
 0x1a9   :  { %173 = vsyncpa [#allocation6], 1 }
 0x1aa   :  { %174 = vsyncpa [#allocation4], 1 }

</bundles_post_ra>
